<compile_context>
chip_gen: v5e
topology: v5e:2x2
jax: 0.10.0
libtpu: 0.0.40
codegen_flags: <defaults>
</compile_context>

<pallas_src>
import jax
import jax.numpy as jnp
from jax.experimental import pallas as pl
from jax.experimental.pallas import tpu as pltpu

BN_EPS = 1e-5      # PyTorch BatchNorm1d default eps
NEG_BIG = -1e9     # bias for padded vocab lanes (excludes them from the LSE)


# ----------------------------------------------------------------------------
# Fused kernel: one layer-group x all V tiles, one scalar loss per layer
# ----------------------------------------------------------------------------
def _cd_fused_kernel(theta_ref,             # VMEM (1, B, K_pad)  bf16
                     beta_ref,              # VMEM (1, K_pad, VT) bf16
                     bias_ref,              # VMEM (1, 1, VT)     f32
                     bow_ref,               # VMEM (B, VT)        bf16
                     loss_ref,              # VMEM (1, 1, 128)    f32 out
                     m_s, l_s, swr_s, sb_s  # VMEM (B, 1) scratch accumulators
                     ):
    v_idx = pl.program_id(1)
    n_v = pl.num_programs(1)

    @pl.when(v_idx == 0)
    def _init():
        m_s[...] = jnp.full_like(m_s, -jnp.inf)
        l_s[...] = jnp.zeros_like(l_s)
        swr_s[...] = jnp.zeros_like(swr_s)
        sb_s[...] = jnp.zeros_like(sb_s)

    theta = theta_ref[0]                                    # (B, K_pad) bf16
    beta = beta_ref[0]                                      # (K_pad, VT) bf16
    # MXU bf16 matmul, f32 accumulation.
    x = jnp.dot(theta, beta, preferred_element_type=jnp.float32)   # (B, VT)

    b = x.shape[0]
    inv_b = 1.0 / b

    # BatchNorm1d(V, affine=False), training mode: per-column stats over the
    # batch, biased variance.  One pass: E[x], E[x^2]; all f32.
    mean = jnp.sum(x, axis=0, keepdims=True) * inv_b        # (1, VT)
    meansq = jnp.sum(x * x, axis=0, keepdims=True) * inv_b  # (1, VT)
    var = meansq - mean * mean
    xn = (x - mean) * jax.lax.rsqrt(var + BN_EPS)

    recon = xn + bias_ref[0]                                # (B, VT) f32
    bow = bow_ref[...].astype(jnp.float32)                  # (B, VT)

    # Online log-sum-exp accumulation over V tiles.
    m_prev = m_s[...]                                       # (B, 1)
    m_new = jnp.maximum(m_prev, jnp.max(recon, axis=-1, keepdims=True))
    l_s[...] = (l_s[...] * jnp.exp(m_prev - m_new)
                + jnp.sum(jnp.exp(recon - m_new), axis=-1, keepdims=True))
    m_s[...] = m_new
    swr_s[...] = swr_s[...] + jnp.sum(bow * recon, axis=-1, keepdims=True)
    sb_s[...] = sb_s[...] + jnp.sum(bow, axis=-1, keepdims=True)

    @pl.when(v_idx == n_v - 1)
    def _finalize():
        # -(bow * log softmax(recon)).sum(axis=1).mean()
        #   = mean_b [ sum(bow) * lse - sum(bow * recon) ]
        lse = m_s[...] + jnp.log(l_s[...])                  # (B, 1)
        per_row = sb_s[...] * lse - swr_s[...]              # (B, 1)
        total = jnp.sum(per_row) * inv_b
        loss_ref[...] = jnp.full(loss_ref.shape, total, loss_ref.dtype)


def _choose_v_tile(v_pad, k_pad, batch, v_tile=None,
                   cap=16384, vmem_budget=16 * 1024 * 1024):
    """Largest 128-multiple divisor of v_pad that fits the VMEM budget."""
    if v_tile is not None:
        assert v_pad % v_tile == 0 and v_tile % 128 == 0
        return v_tile
    # bytes per lane column: double-buffered bf16 beta + bf16 bow + f32 bias,
    # plus ~4 f32 (B, vt)-shaped temporaries inside the kernel body.
    per_lane = 2 * (2 * k_pad + 2 * batch + 4) + 16 * batch
    limit = min(cap, max(128, vmem_budget // per_lane), v_pad)
    best = 128
    t = 128
    while t <= limit:
        if v_pad % t == 0:
            best = t
        t += 128
    return best


# ----------------------------------------------------------------------------
# Glue (plain JAX): top-k bias preprocessing + packing + per-group pallas_call
# ----------------------------------------------------------------------------
def get_topk_tensor(matrix, topk):
    # keep the top-k values per row, zero elsewhere (utils.get_topk_tensor)
    # TODO(synk): no Pallas top-k primitive; selection is done in plain JAX.
    vals = jax.lax.top_k(matrix, topk)[0]
    kth = vals[:, -1:]
    return jnp.where(matrix >= kth, matrix, jnp.zeros_like(matrix))


def cd_decoder_forward(input_bow, theta_list, beta_list, bias_vectors,
                       bias_p, bias_topk, v_tile=None,
                       matmul_dtype=jnp.bfloat16):
    num_layers = len(theta_list)
    B, V = input_bow.shape
    v_pad = ((V + 127) // 128) * 128

    # detached top-k neighbour bias + fused bias precompute (f32, JAX side)
    topk_bias_list = [
        jax.lax.stop_gradient(
            get_topk_tensor(b.astype(jnp.float32), bias_topk).sum(0))
        for b in beta_list
    ]
    bias_rows = []
    for lid in range(num_layers):
        tb = jnp.zeros((V,), jnp.float32)
        if lid > 0:
            tb = tb + topk_bias_list[lid - 1]
        if lid < num_layers - 1:
            tb = tb + topk_bias_list[lid + 1]
        bvec = bias_vectors[lid].reshape(V).astype(jnp.float32)
        bias = jnp.where(tb > 0.0, bias_p * tb, bvec)
        if v_pad > V:
            bias = jnp.pad(bias, (0, v_pad - V), constant_values=NEG_BIG)
        bias_rows.append(bias.reshape(1, v_pad))

    bow = input_bow.astype(matmul_dtype)
    if v_pad > V:
        bow = jnp.pad(bow, ((0, 0), (0, v_pad - V)))        # zeros on pad lanes

    # group layers by (padded) topic count so no layer streams beta padded to
    # the global K_max
    def _k_pad(k):
        return max(16, ((k + 15) // 16) * 16)

    groups, order = {}, []
    for lid, t in enumerate(theta_list):
        kp = _k_pad(t.shape[1])
        if kp not in groups:
            groups[kp] = []
            order.append(kp)
        groups[kp].append(lid)

    per_layer_loss = [None] * num_layers
    for kp in order:
        layer_ids = groups[kp]
        lg = len(layer_ids)

        theta_stack = jnp.stack([
            jnp.pad(theta_list[lid].astype(matmul_dtype),
                    ((0, 0), (0, kp - theta_list[lid].shape[1])))
            for lid in layer_ids])                                  # (Lg,B,Kp)
        beta_stack = jnp.stack([
            jnp.pad(beta_list[lid].astype(matmul_dtype),
                    ((0, kp - beta_list[lid].shape[0]), (0, v_pad - V)))
            for lid in layer_ids])                                  # (Lg,Kp,Vp)
        bias_stack = jnp.stack([bias_rows[lid] for lid in layer_ids])  # (Lg,1,Vp)

        vt = _choose_v_tile(v_pad, kp, B, v_tile)
        n_v = v_pad // vt

        out = pl.pallas_call(
            _cd_fused_kernel,
            out_shape=jax.ShapeDtypeStruct((lg, 1, 128), jnp.float32),
            grid=(lg, n_v),
            in_specs=[
                pl.BlockSpec((1, B, kp), lambda l, v: (l, 0, 0)),    # theta
                pl.BlockSpec((1, kp, vt), lambda l, v: (l, 0, v)),   # beta
                pl.BlockSpec((1, 1, vt), lambda l, v: (l, 0, v)),    # bias
                pl.BlockSpec((B, vt), lambda l, v: (0, v)),          # bow
            ],
            out_specs=pl.BlockSpec((1, 1, 128), lambda l, v: (l, 0, 0)),
            scratch_shapes=[pltpu.VMEM((B, 1), jnp.float32),   # running max
                            pltpu.VMEM((B, 1), jnp.float32),   # running sumexp
                            pltpu.VMEM((B, 1), jnp.float32),   # sum(bow*recon)
                            pltpu.VMEM((B, 1), jnp.float32)],  # sum(bow)
            compiler_params=pltpu.CompilerParams(
                dimension_semantics=("parallel", "arbitrary"),
                vmem_limit_bytes=32 * 1024 * 1024),
        )(theta_stack, beta_stack, bias_stack, bow)

        losses = out[:, 0, 0]                                       # (Lg,)
        for i, lid in enumerate(layer_ids):
            per_layer_loss[lid] = losses[i]

    return jnp.stack(per_layer_loss).sum() / num_layers


# ----------------------------------------------------------------------------
# Pure-JAX reference (mirrors the PyTorch forward) for verification
# ----------------------------------------------------------------------------
def reference_forward(input_bow, theta_list, beta_list, bias_vectors,
                      bias_p, bias_topk, matmul_dtype=None):
    num_layers = len(theta_list)
    topk_bias_list = [get_topk_tensor(b, bias_topk).sum(0) for b in beta_list]
    total = 0.0
    for lid in range(num_layers):
        tb = jnp.zeros_like(topk_bias_list[lid])
        if lid > 0:
            tb = tb + topk_bias_list[lid - 1]
        if lid < num_layers - 1:
            tb = tb + topk_bias_list[lid + 1]
        mask = (tb > 0).astype(jnp.float32)
        bias = bias_p * tb * mask + bias_vectors[lid][0] * (1.0 - mask)
        th, be = theta_list[lid], beta_list[lid]
        if matmul_dtype is not None:   # emulate the kernel's input quantization
            th = th.astype(matmul_dtype).astype(jnp.float32)
            be = be.astype(matmul_dtype).astype(jnp.float32)
        x = th @ be
        mean = jnp.mean(x, axis=0, keepdims=True)
        var = jnp.mean((x - mean) ** 2, axis=0, keepdims=True)
        recon = (x - mean) / jnp.sqrt(var + BN_EPS) + bias[None, :]
        recon = jax.nn.softmax(recon, axis=-1)
        loss = -(input_bow * jnp.log(recon + 1e-12)).sum(axis=1).mean()
        total = total + loss
    return total / num_layers


# ----------------------------------------------------------------------------
if __name__ == "__main__":
    key = jax.random.PRNGKey(0)

    B, V = 8, 256
    num_layers = 3
    Ks = [16, 32, 64]          # topic counts per layer (ragged on purpose)
    bias_p = 0.5
    bias_topk = 16

    keys = jax.random.split(key, 1 + 3 * num_layers)
    k_bow, rest = keys[0], keys[1:]

    # bag-of-words counts (non-negative)
    input_bow = jax.random.poisson(k_bow, 1.0, (B, V)).astype(jnp.float32)

    theta_list, beta_list, bias_vectors = [], [], []
    for lid in range(num_layers):
        k_t, k_b, k_v = rest[3 * lid], rest[3 * lid + 1], rest[3 * lid + 2]
        theta = jax.nn.softmax(jax.random.normal(k_t, (B, Ks[lid]),
                                                 jnp.float32), axis=-1)
        beta = jax.random.normal(k_b, (Ks[lid], V), jnp.float32)
        # xavier_uniform_ on a (1, V) tensor: bound = sqrt(6 / (1 + V))
        bound = (6.0 / (1.0 + V)) ** 0.5
        bvec = jax.random.uniform(k_v, (1, V), jnp.float32, -bound, bound)
        theta_list.append(theta)
        beta_list.append(beta)
        bias_vectors.append(bvec)

    # default tile selection (single V tile here) ...
    loss = cd_decoder_forward(input_bow, theta_list, beta_list, bias_vectors,
                              bias_p, bias_topk)
    loss = jax.block_until_ready(loss)
    # ... and an explicit v_tile=128 run to exercise the online-LSE tiled path
    loss_tiled = cd_decoder_forward(input_bow, theta_list, beta_list,
                                    bias_vectors, bias_p, bias_topk,
                                    v_tile=128)
    loss_tiled = jax.block_until_ready(loss_tiled)

    # reference with the same bf16 input quantization (validates kernel math)
    ref_q = reference_forward(input_bow, theta_list, beta_list, bias_vectors,
                              bias_p, bias_topk, matmul_dtype=jnp.bfloat16)
    ref_q = jax.block_until_ready(ref_q)
    # full f32 reference (sanity check on the bf16 quantization error)
    ref_f32 = reference_forward(input_bow, theta_list, beta_list, bias_vectors,
                                bias_p, bias_topk)
    ref_f32 = jax.block_until_ready(ref_f32)

    assert jnp.isfinite(loss), "non-finite loss from Pallas kernel"
    assert jnp.isfinite(loss_tiled), "non-finite loss from tiled Pallas kernel"
    assert jnp.allclose(loss, ref_q, rtol=2e-3, atol=2e-3), (loss, ref_q)
    assert jnp.allclose(loss_tiled, ref_q, rtol=2e-3, atol=2e-3), (loss_tiled,
                                                                   ref_q)
    assert jnp.allclose(loss, ref_f32, rtol=2e-2, atol=2e-2), (loss, ref_f32)
    print("KERNEL_OK")
</pallas_src>

<mosaic_0001>
module attributes {stable_mosaic.version = 11 : i64} {
  func.func @_cd_fused_kernel(%arg0: i32, %arg1: i32, %arg2: memref<1x8x16xbf16, #tpu.memory_space<vmem>>, %arg3: memref<1x16x256xbf16, #tpu.memory_space<vmem>>, %arg4: memref<1x1x256xf32, #tpu.memory_space<vmem>>, %arg5: memref<8x256xbf16, #tpu.memory_space<vmem>>, %arg6: memref<1x1x128xf32, #tpu.memory_space<vmem>>, %arg7: memref<8x1xf32, #tpu.memory_space<vmem>>, %arg8: memref<8x1xf32, #tpu.memory_space<vmem>>, %arg9: memref<8x1xf32, #tpu.memory_space<vmem>>, %arg10: memref<8x1xf32, #tpu.memory_space<vmem>>) attributes {dimension_semantics = [#tpu.dimension_semantics<parallel>, #tpu.dimension_semantics<arbitrary>], iteration_bounds = array<i64: 1, 1>, scalar_prefetch = 0 : i64, scratch_operands = 4 : i64, tpu.core_type = #tpu.core_type<tc>, window_params = [{transform_indices = @transform_0, window_bounds = array<i64: 1, 8, 16>}, {transform_indices = @transform_1, window_bounds = array<i64: 1, 16, 256>}, {transform_indices = @transform_2, window_bounds = array<i64: 1, 1, 256>}, {transform_indices = @transform_3, window_bounds = array<i64: 8, 256>}, {transform_indices = @transform_4, window_bounds = array<i64: 1, 1, 128>}]} {
    %c0_i32 = arith.constant 0 : i32
    %0 = arith.cmpi eq, %arg1, %c0_i32 : i32
    %1 = arith.extui %0 : i1 to i32
    %c0_i32_0 = arith.constant 0 : i32
    %2 = arith.cmpi ne, %1, %c0_i32_0 : i32
    scf.if %2 {
      %cst_38 = arith.constant 0xFF800000 : f32
      %62 = vector.broadcast %cst_38 : f32 to vector<8x1xf32>
      %c0_39 = arith.constant 0 : index
      %c0_40 = arith.constant 0 : index
      %63 = vector.load %arg7[%c0_39, %c0_40] : memref<8x1xf32, #tpu.memory_space<vmem>>, vector<8x1xf32>
      tpu.vector_store %arg7[%c0_39, %c0_40], %62 {strides = array<i32>} : memref<8x1xf32, #tpu.memory_space<vmem>>, vector<8x1xf32>,
      %cst_41 = arith.constant 0.000000e+00 : f32
      %64 = vector.broadcast %cst_41 : f32 to vector<8x1xf32>
      %c0_42 = arith.constant 0 : index
      %c0_43 = arith.constant 0 : index
      %65 = vector.load %arg8[%c0_42, %c0_43] : memref<8x1xf32, #tpu.memory_space<vmem>>, vector<8x1xf32>
      tpu.vector_store %arg8[%c0_42, %c0_43], %64 {strides = array<i32>} : memref<8x1xf32, #tpu.memory_space<vmem>>, vector<8x1xf32>,
      %cst_44 = arith.constant 0.000000e+00 : f32
      %66 = vector.broadcast %cst_44 : f32 to vector<8x1xf32>
      %c0_45 = arith.constant 0 : index
      %c0_46 = arith.constant 0 : index
      %67 = vector.load %arg9[%c0_45, %c0_46] : memref<8x1xf32, #tpu.memory_space<vmem>>, vector<8x1xf32>
      tpu.vector_store %arg9[%c0_45, %c0_46], %66 {strides = array<i32>} : memref<8x1xf32, #tpu.memory_space<vmem>>, vector<8x1xf32>,
      %cst_47 = arith.constant 0.000000e+00 : f32
      %68 = vector.broadcast %cst_47 : f32 to vector<8x1xf32>
      %c0_48 = arith.constant 0 : index
      %c0_49 = arith.constant 0 : index
      %69 = vector.load %arg10[%c0_48, %c0_49] : memref<8x1xf32, #tpu.memory_space<vmem>>, vector<8x1xf32>
      tpu.vector_store %arg10[%c0_48, %c0_49], %68 {strides = array<i32>} : memref<8x1xf32, #tpu.memory_space<vmem>>, vector<8x1xf32>,
    } else {
    }
    %c0 = arith.constant 0 : index
    %c0_1 = arith.constant 0 : index
    %c0_2 = arith.constant 0 : index
    %3 = vector.load %arg2[%c0, %c0_1, %c0_2] : memref<1x8x16xbf16, #tpu.memory_space<vmem>>, vector<1x8x16xbf16>
    %4 = vector.shape_cast %3 : vector<1x8x16xbf16> to vector<8x16xbf16>
    %c0_3 = arith.constant 0 : index
    %c0_4 = arith.constant 0 : index
    %c0_5 = arith.constant 0 : index
    %5 = vector.load %arg3[%c0_3, %c0_4, %c0_5] : memref<1x16x256xbf16, #tpu.memory_space<vmem>>, vector<1x16x256xbf16>
    %6 = vector.shape_cast %5 : vector<1x16x256xbf16> to vector<16x256xbf16>
    %cst = arith.constant dense<0.000000e+00> : vector<8x256xf32>
    %7 = tpu.matmul %4, %6, %cst {dimension_numbers = #tpu.dot_dimension_numbers<[1], [0], [0], [1], [0, 0, 1, 1], [], []>} : vector<8x16xbf16>, vector<16x256xbf16>, vector<8x256xf32> -> vector<8x256xf32>
    %cst_6 = arith.constant dense<0.000000e+00> : vector<256xf32>
    %8 = vector.multi_reduction <add>, %7, %cst_6 [0] : vector<8x256xf32> to vector<256xf32>
    %9 = vector.shape_cast %8 : vector<256xf32> to vector<1x256xf32>
    %cst_7 = arith.constant 1.250000e-01 : f32
    %10 = vector.broadcast %cst_7 : f32 to vector<1x256xf32>
    %11 = arith.mulf %9, %10 : vector<1x256xf32>
    %12 = arith.mulf %7, %7 : vector<8x256xf32>
    %cst_8 = arith.constant dense<0.000000e+00> : vector<256xf32>
    %13 = vector.multi_reduction <add>, %12, %cst_8 [0] : vector<8x256xf32> to vector<256xf32>
    %14 = vector.shape_cast %13 : vector<256xf32> to vector<1x256xf32>
    %cst_9 = arith.constant 1.250000e-01 : f32
    %15 = vector.broadcast %cst_9 : f32 to vector<1x256xf32>
    %16 = arith.mulf %14, %15 : vector<1x256xf32>
    %17 = arith.mulf %11, %11 : vector<1x256xf32>
    %18 = arith.subf %16, %17 : vector<1x256xf32>
    %19 = vector.broadcast %11 : vector<1x256xf32> to vector<8x256xf32>
    %20 = arith.subf %7, %19 : vector<8x256xf32>
    %cst_10 = arith.constant 9.99999974E-6 : f32
    %21 = vector.broadcast %cst_10 : f32 to vector<1x256xf32>
    %22 = arith.addf %18, %21 : vector<1x256xf32>
    %23 = math.rsqrt %22 : vector<1x256xf32>
    %24 = vector.broadcast %23 : vector<1x256xf32> to vector<8x256xf32>
    %25 = arith.mulf %20, %24 : vector<8x256xf32>
    %c0_11 = arith.constant 0 : index
    %c0_12 = arith.constant 0 : index
    %c0_13 = arith.constant 0 : index
    %26 = vector.load %arg4[%c0_11, %c0_12, %c0_13] : memref<1x1x256xf32, #tpu.memory_space<vmem>>, vector<1x1x256xf32>
    %27 = vector.shape_cast %26 : vector<1x1x256xf32> to vector<1x256xf32>
    %28 = vector.broadcast %27 : vector<1x256xf32> to vector<8x256xf32>
    %29 = arith.addf %25, %28 : vector<8x256xf32>
    %c0_14 = arith.constant 0 : index
    %c0_15 = arith.constant 0 : index
    %30 = vector.load %arg5[%c0_14, %c0_15] : memref<8x256xbf16, #tpu.memory_space<vmem>>, vector<8x256xbf16>
    %31 = arith.extf %30 : vector<8x256xbf16> to vector<8x256xf32>
    %c0_16 = arith.constant 0 : index
    %c0_17 = arith.constant 0 : index
    %32 = vector.load %arg7[%c0_16, %c0_17] : memref<8x1xf32, #tpu.memory_space<vmem>>, vector<8x1xf32>
    %cst_18 = arith.constant dense<0xFF800000> : vector<8xf32>
    %33 = vector.multi_reduction <maximumf>, %29, %cst_18 [1] : vector<8x256xf32> to vector<8xf32>
    %34 = vector.shape_cast %33 : vector<8xf32> to vector<8x1xf32>
    %35 = arith.maximumf %32, %34 : vector<8x1xf32>
    %c0_19 = arith.constant 0 : index
    %c0_20 = arith.constant 0 : index
    %36 = vector.load %arg8[%c0_19, %c0_20] : memref<8x1xf32, #tpu.memory_space<vmem>>, vector<8x1xf32>
    %37 = arith.subf %32, %35 : vector<8x1xf32>
    %38 = math.exp %37 : vector<8x1xf32>
    %39 = arith.mulf %36, %38 : vector<8x1xf32>
    %40 = vector.broadcast %35 : vector<8x1xf32> to vector<8x256xf32>
    %41 = arith.subf %29, %40 : vector<8x256xf32>
    %42 = math.exp %41 : vector<8x256xf32>
    %cst_21 = arith.constant dense<0.000000e+00> : vector<8xf32>
    %43 = vector.multi_reduction <add>, %42, %cst_21 [1] : vector<8x256xf32> to vector<8xf32>
    %44 = vector.shape_cast %43 : vector<8xf32> to vector<8x1xf32>
    %45 = arith.addf %39, %44 : vector<8x1xf32>
    %c0_22 = arith.constant 0 : index
    %c0_23 = arith.constant 0 : index
    %46 = vector.load %arg8[%c0_22, %c0_23] : memref<8x1xf32, #tpu.memory_space<vmem>>, vector<8x1xf32>
    tpu.vector_store %arg8[%c0_22, %c0_23], %45 {strides = array<i32>} : memref<8x1xf32, #tpu.memory_space<vmem>>, vector<8x1xf32>,
    %c0_24 = arith.constant 0 : index
    %c0_25 = arith.constant 0 : index
    %47 = vector.load %arg7[%c0_24, %c0_25] : memref<8x1xf32, #tpu.memory_space<vmem>>, vector<8x1xf32>
    tpu.vector_store %arg7[%c0_24, %c0_25], %35 {strides = array<i32>} : memref<8x1xf32, #tpu.memory_space<vmem>>, vector<8x1xf32>,
    %c0_26 = arith.constant 0 : index
    %c0_27 = arith.constant 0 : index
    %48 = vector.load %arg9[%c0_26, %c0_27] : memref<8x1xf32, #tpu.memory_space<vmem>>, vector<8x1xf32>
    %49 = arith.mulf %31, %29 : vector<8x256xf32>
    %cst_28 = arith.constant dense<0.000000e+00> : vector<8xf32>
    %50 = vector.multi_reduction <add>, %49, %cst_28 [1] : vector<8x256xf32> to vector<8xf32>
    %51 = vector.shape_cast %50 : vector<8xf32> to vector<8x1xf32>
    %52 = arith.addf %48, %51 : vector<8x1xf32>
    %c0_29 = arith.constant 0 : index
    %c0_30 = arith.constant 0 : index
    %53 = vector.load %arg9[%c0_29, %c0_30] : memref<8x1xf32, #tpu.memory_space<vmem>>, vector<8x1xf32>
    tpu.vector_store %arg9[%c0_29, %c0_30], %52 {strides = array<i32>} : memref<8x1xf32, #tpu.memory_space<vmem>>, vector<8x1xf32>,
    %c0_31 = arith.constant 0 : index
    %c0_32 = arith.constant 0 : index
    %54 = vector.load %arg10[%c0_31, %c0_32] : memref<8x1xf32, #tpu.memory_space<vmem>>, vector<8x1xf32>
    %cst_33 = arith.constant dense<0.000000e+00> : vector<8xf32>
    %55 = vector.multi_reduction <add>, %31, %cst_33 [1] : vector<8x256xf32> to vector<8xf32>
    %56 = vector.shape_cast %55 : vector<8xf32> to vector<8x1xf32>
    %57 = arith.addf %54, %56 : vector<8x1xf32>
    %c0_34 = arith.constant 0 : index
    %c0_35 = arith.constant 0 : index
    %58 = vector.load %arg10[%c0_34, %c0_35] : memref<8x1xf32, #tpu.memory_space<vmem>>, vector<8x1xf32>
    tpu.vector_store %arg10[%c0_34, %c0_35], %57 {strides = array<i32>} : memref<8x1xf32, #tpu.memory_space<vmem>>, vector<8x1xf32>,
    %c0_i32_36 = arith.constant 0 : i32
    %59 = arith.cmpi eq, %arg1, %c0_i32_36 : i32
    %60 = arith.extui %59 : i1 to i32
    %c0_i32_37 = arith.constant 0 : i32
    %61 = arith.cmpi ne, %60, %c0_i32_37 : i32
    scf.if %61 {
      %c0_38 = arith.constant 0 : index
      %c0_39 = arith.constant 0 : index
      %62 = vector.load %arg7[%c0_38, %c0_39] : memref<8x1xf32, #tpu.memory_space<vmem>>, vector<8x1xf32>
      %c0_40 = arith.constant 0 : index
      %c0_41 = arith.constant 0 : index
      %63 = vector.load %arg8[%c0_40, %c0_41] : memref<8x1xf32, #tpu.memory_space<vmem>>, vector<8x1xf32>
      %64 = math.log %63 : vector<8x1xf32>
      %65 = arith.addf %62, %64 : vector<8x1xf32>
      %c0_42 = arith.constant 0 : index
      %c0_43 = arith.constant 0 : index
      %66 = vector.load %arg10[%c0_42, %c0_43] : memref<8x1xf32, #tpu.memory_space<vmem>>, vector<8x1xf32>
      %67 = arith.mulf %66, %65 : vector<8x1xf32>
      %c0_44 = arith.constant 0 : index
      %c0_45 = arith.constant 0 : index
      %68 = vector.load %arg9[%c0_44, %c0_45] : memref<8x1xf32, #tpu.memory_space<vmem>>, vector<8x1xf32>
      %69 = arith.subf %67, %68 : vector<8x1xf32>
      %70 = vector.shape_cast %69 : vector<8x1xf32> to vector<1x8x1xf32>
      %cst_46 = arith.constant dense<0.000000e+00> : vector<1xf32>
      %71 = vector.multi_reduction <add>, %70, %cst_46 [1, 2] : vector<1x8x1xf32> to vector<1xf32>
      %72 = vector.shape_cast %71 : vector<1xf32> to vector<1x1x1xf32>
      %73 = vector.extract %72[0, 0, 0] : f32 from vector<1x1x1xf32>
      %cst_47 = arith.constant 1.250000e-01 : f32
      %74 = arith.mulf %73, %cst_47 : f32
      %75 = vector.broadcast %74 : f32 to vector<1x1x128xf32>
      %c0_48 = arith.constant 0 : index
      %c0_49 = arith.constant 0 : index
      %c0_50 = arith.constant 0 : index
      %76 = vector.load %arg6[%c0_48, %c0_49, %c0_50] : memref<1x1x128xf32, #tpu.memory_space<vmem>>, vector<1x1x128xf32>
      tpu.vector_store %arg6[%c0_48, %c0_49, %c0_50], %75 {strides = array<i32>} : memref<1x1x128xf32, #tpu.memory_space<vmem>>, vector<1x1x128xf32>,
    } else {
    }
    return
  }
  func.func @transform_0(%arg0: i32, %arg1: i32) -> (i32, i32, i32) {
    %c0_i32 = arith.constant 0 : i32
    %c0_i32_0 = arith.constant 0 : i32
    %c0_i32_1 = arith.constant 0 : i32
    return %arg0, %c0_i32, %c0_i32_0 : i32, i32, i32
  }
  func.func @transform_1(%arg0: i32, %arg1: i32) -> (i32, i32, i32) {
    %c0_i32 = arith.constant 0 : i32
    %c0_i32_0 = arith.constant 0 : i32
    return %arg0, %c0_i32, %arg1 : i32, i32, i32
  }
  func.func @transform_2(%arg0: i32, %arg1: i32) -> (i32, i32, i32) {
    %c0_i32 = arith.constant 0 : i32
    %c0_i32_0 = arith.constant 0 : i32
    return %arg0, %c0_i32, %arg1 : i32, i32, i32
  }
  func.func @transform_3(%arg0: i32, %arg1: i32) -> (i32, i32) {
    %c0_i32 = arith.constant 0 : i32
    %c0_i32_0 = arith.constant 0 : i32
    return %c0_i32, %arg1 : i32, i32
  }
  func.func @transform_4(%arg0: i32, %arg1: i32) -> (i32, i32, i32) {
    %c0_i32 = arith.constant 0 : i32
    %c0_i32_0 = arith.constant 0 : i32
    %c0_i32_1 = arith.constant 0 : i32
    return %arg0, %c0_i32, %c0_i32_0 : i32, i32, i32
  }
}

</mosaic_0001>

<bundles_post_ra>
// kernel: tpu_custom_call.1
= control target key start
LH: loop header
LB: loop body
LE: loop exit
PB: predicated region body
PF: predicated region fallthrough
CT: control target
= control target key end

     0   :  { %9 = vsyncpa [#allocation7], 0  ;;  %s523_s0 = inlined_call_operand.hbm [shape: bf16[1,8,16], index: 0, kind: input, shape index: {}]   ;;  %s524_s1 = inlined_call_operand.hbm [shape: bf16[1,16,256], index: 1, kind: input, shape index: {}]   ;;  %s525_s2 = inlined_call_operand.hbm [shape: f32[1,1,256], index: 2, kind: input, shape index: {}]   ;;  %s526_s3 = inlined_call_operand.hbm [shape: bf16[8,256], index: 3, kind: input, shape index: {}]   ;;  %s527_s4 = inlined_call_operand.hbm [shape: f32[1,1,128], index: 4, kind: output, shape index: {}]  }
   0x1   :  { %10 = vsyncpa [#allocation10], 0 }
   0x2   :  { %11 = vsyncpa [#allocation13], 0  ;;  %s28_s17 = sshll.u32 %s524_s1, 4  ;;  %s29_s17 = int_to_ptr.hbm [resolvable:$true] %s28_s17 }
   0x3   :  { %12 = vsyncpa [#allocation8], 0  ;;  %s450_s18 = smov [#allocation9]   ;;  %s18_s22 = sshll.u32 %s523_s0, 4  ;;  %s19_s22 = int_to_ptr.hbm [resolvable:$true] %s18_s22 }
   0x4   :  { %s30_s19 = sshll.u32 %s450_s18, 4  ;;  %s451_s23 = smov 128   ;;  %s31_s19 = int_to_ptr.vmem [resolvable:$true] %s30_s19 }
   0x5   :  { %s452_s24 = smov 8   ;;  %s453_s25 = smov [#allocation6]  }
   0x6   :  { %36 = dma.hbm_to_vmem [thread:$0]  %s29_s17, 256, %s31_s19, [#allocation10], %s451_s23, %s451_s23, %s452_s24  }
   0x7   :  { %s20_s26 = sshll.u32 %s453_s25, 4  ;;  %s42_s29 = sshll.u32 %s525_s2, 4  ;;  %s21_s26 = int_to_ptr.vmem [resolvable:$true] %s20_s26  ;;  %s43_s29 = int_to_ptr.hbm [resolvable:$true] %s42_s29 }
   0x8   :  { %23 = dma.hbm_to_vmem [thread:$0]  %s19_s22, 64, %s21_s26, [#allocation7]  }
   0x9   :  { %s53_s5 = sshll.u32 %s526_s3, 4  ;;  %s454_s6 = smov [#allocation11]   ;;  %s54_s5 = int_to_ptr.hbm [resolvable:$true] %s53_s5 }
   0xa   :  { %s44_s7 = sshll.u32 %s454_s6, 4  ;;  %s455_s0 = smov [#allocation12]   ;;  %s45_s7 = int_to_ptr.vmem [resolvable:$true] %s44_s7 }
   0xb   :  { %47 = dma.hbm_to_vmem [thread:$0]  %s43_s29, 32, %s45_s7, [#allocation10]  }
   0xc   :  { %s55_s8 = sshll.u32 %s455_s0, 4  ;;  %s56_s8 = int_to_ptr.vmem [resolvable:$true] %s55_s8 }
   0xd   :  { %58 = dma.hbm_to_vmem [thread:$0]  %s54_s5, 128, %s56_s8, [#allocation13]  }
   0xe   :  { %442 = dma.done.wait [#allocation7], 64  }
   0xf   :  { %443 = vsyncadd [#allocation7], 4294967232 }
  0x10   :  { %444 = dma.done.wait [#allocation10], 288  }
  0x11   :  { %445 = vsyncadd [#allocation10], 4294967008 }
  0x12   :  { %446 = dma.done.wait [#allocation13], 128  }
  0x13   :  { %447 = vsyncadd [#allocation13], 4294967168  ;;  %v287_v0 = vld [vmem:[#allocation9] sm:$0xf]  ;;  %v296_v1 = vld [vmem:[#allocation9 + $0x4] sm:$0xf0] }
  0x14   :  { %v295_v2 = vld [vmem:[#allocation9 + $0x4] sm:$0xf]  ;;  %v288_v3 = vor.u32 %v296_v1, %v287_v0  ;;  %v289_v4 = vld [vmem:[#allocation9 + $0x8] sm:$0xf0]  ;;  %v85_v6 = vld [vmem:[#allocation6] sm:$0xf] }
  0x15   :  { %v292_v5 = vor.u32 %v295_v2, %v289_v4  ;;  %vm98_vm0 = vcmask 130048   ;;  %vm80_vm1 = vcmask 7168   ;;  %v456_v45 = vmov -inf   ;;  %v188_v57 = vld [vmem:[#allocation11] sm:$0x3]  ;;  %v196_v60 = vld [vmem:[#allocation12] sm:$0xff] }
  0x16   :  { %109 = vmatpush.bf16.msra.mxu0 %v288_v3  ;;  %81 = vst.msk [vmem:[#allocation2] sm:$0xff] %vm80_vm1, %v456_v45  ;;  %v190_v63 = vperm.slane %v188_v57, 0  ;;  %v191_v2 = vperm.slane %v188_v57, 1  ;;  %s459_s2 = smov [#allocation14]   ;;  %s273_s11 = sshll.u32 %s527_s4, 4  ;;  %s274_s11 = int_to_ptr.hbm [resolvable:$true] %s273_s11 }
  0x17   :  { %122 = vmatpush.bf16.msra.mxu1 %v292_v5  ;;  %v197_v5 = vunpack.c.l.bf16 %v196_v60  ;;  %s271_s3 = sshll.u32 %s459_s2, 4  ;;  %s272_s3 = int_to_ptr.vmem [resolvable:$true] %s271_s3 }
  0x19   :  { %293 = vmatmul.msk.bf16.vlgmr.msra.gmra.mxu0 %vm98_vm0, %v85_v6 }
  0x1a   :  { %294 = vmatmul.msk.bf16.vlgmr.msra.gmra.mxu1 %vm98_vm0, %v85_v6 }
  0x96   :  { %v497_v7 = vpop.f32.mrf.mxu0 }
  0x97   :  { %v128_v8 = vrot.slane %v497_v7, 4  ;;  %v142_v9 = vmul.f32 %v497_v7, %v497_v7  ;;  %v502_v10 = vpop.f32.mrf.mxu1 }
  0x98   :  { %v134_v11 = vrot.slane %v502_v10, 4  ;;  %v143_v12 = vmul.f32 %v502_v10, %v502_v10 }
  0x99   :  { %v129_v13 = vadd.f32 %v128_v8, %v497_v7  ;;  %v144_v14 = vrot.slane %v142_v9, 4  ;;  %v198_v8 = vunpack.c.h.bf16 %v196_v60 }
  0x9a   :  { %v135_v15 = vadd.f32 %v134_v11, %v502_v10  ;;  %v150_v16 = vrot.slane %v143_v12, 4 }
  0x9b   :  { %v130_v17 = vrot.slane %v129_v13, 2  ;;  %v145_v18 = vadd.f32 %v144_v14, %v142_v9 }
  0x9c   :  { %v136_v19 = vrot.slane %v135_v15, 2  ;;  %v151_v20 = vadd.f32 %v150_v16, %v143_v12  ;;  %v199_v16 = vld [vmem:[#allocation2] sm:$0xff] }
  0x9d   :  { %v131_v21 = vadd.f32 %v130_v17, %v129_v13  ;;  %v146_v22 = vrot.slane %v145_v18, 2 }
  0x9e   :  { %v137_v23 = vadd.f32 %v136_v19, %v135_v15  ;;  %v152_v24 = vrot.slane %v151_v20, 2  ;;  %v113_v25 = vpop.f32.mrf.mxu0  ;;  %v457_v15 = vmov 0.0  }
  0x9f   :  { %v132_v26 = vrot.slane %v131_v21, 1  ;;  %v147_v27 = vadd.f32 %v146_v22, %v145_v18  ;;  %v126_v28 = vpop.f32.mrf.mxu1  ;;  %83 = vst.msk [vmem:[#allocation4] sm:$0xff] %vm80_vm1, %v457_v15 }
  0xa0   :  { %v138_v29 = vrot.slane %v137_v23, 1  ;;  %v153_v30 = vadd.f32 %v152_v24, %v151_v20  ;;  %82 = vst.msk [vmem:[#allocation3] sm:$0xff] %vm80_vm1, %v457_v15 }
  0xa1   :  { %v133_v31 = vadd.f32 %v132_v26, %v131_v21  ;;  %v148_v32 = vrot.slane %v147_v27, 1  ;;  %84 = vst.msk [vmem:[#allocation5] sm:$0xff] %vm80_vm1, %v457_v15 }
  0xa2   :  { %v139_v33 = vadd.f32 %v138_v29, %v137_v23  ;;  %v154_v34 = vrot.slane %v153_v30, 1 }
  0xa3   :  { %v140_v35 = vmul.f32 0.125, %v133_v31  ;;  %v149_v36 = vadd.f32 %v148_v32, %v147_v27  ;;  %v236_v31 = vadd.f32 %v198_v8, %v197_v5 }
  0xa4   :  { %v141_v37 = vmul.f32 0.125, %v139_v33  ;;  %v155_v38 = vadd.f32 %v154_v34, %v153_v30 }
  0xa5   :  { %v156_v39 = vmul.f32 0.125, %v149_v36  ;;  %v158_v40 = vmul.f32 %v140_v35, %v140_v35  ;;  %v162_v61 = vsub.f32 %v497_v7, %v140_v35 }
  0xa6   :  { %v157_v41 = vmul.f32 0.125, %v155_v38  ;;  %v159_v42 = vmul.f32 %v141_v37, %v141_v37  ;;  %v163_v0 = vsub.f32 %v502_v10, %v141_v37  ;;  %v458_v10 = vmov 0   ;;  %v227_v18 = vld [vmem:[#allocation4] sm:$0xff] }
  0xa7   :  { %v160_v43 = vsub.f32 %v156_v39, %v158_v40  ;;  %309 = vset.pattern.permute.xlu0 %v458_v10  ;;  %v204_v34 = vld [vmem:[#allocation3] sm:$0xff] }
  0xa8   :  { %v161_v44 = vsub.f32 %v157_v41, %v159_v42  ;;  %v235_v38 = vld [vmem:[#allocation5] sm:$0xff] }
  0xa9   :  { %v164_v46 = vadd.f32 1e-05, %v160_v43 }
  0xaa   :  { %v165_v47 = vadd.f32 1e-05, %v161_v44 }
  0xab   :  { %310 = vrsqrt.f32 %v164_v46  ;;  %vm172_vm4 = vweird.f32 %v164_v46 }
  0xac   :  { %312 = vrsqrt.f32 %v165_v47  ;;  %vm182_vm6 = vweird.f32 %v165_v47 }
  0xb1   :  { %v311_v48 = vpop.eup %310 }
  0xb2   :  { %v313_v49 = vpop.eup %312  ;;  %v167_v50 = vmul.f32 %v311_v48, %v164_v46  ;;  %vm173_vm2 = vweird.f32 %v311_v48 }
  0xb3   :  { %v177_v51 = vmul.f32 %v313_v49, %v165_v47  ;;  %vm183_vm3 = vweird.f32 %v313_v49  ;;  %vm174_vm5 = vmor %vm172_vm4, %vm173_vm2 }
  0xb4   :  { %v168_v52 = vmul.f32 %v311_v48, %v167_v50  ;;  %vm184_vm7 = vmor %vm182_vm6, %vm183_vm3 }
  0xb5   :  { %v178_v53 = vmul.f32 %v313_v49, %v177_v51 }
  0xb6   :  { %v169_v54 = vmul.f32 0.5, %v168_v52 }
  0xb7   :  { %v179_v55 = vmul.f32 0.5, %v178_v53 }
  0xb8   :  { %v170_v56 = vsub.f32 1.5, %v169_v54 }
  0xb9   :  { %v180_v58 = vsub.f32 1.5, %v179_v55 }
  0xba   :  { %v171_v59 = vmul.f32 %v311_v48, %v170_v56 }
  0xbb   :  { %v181_v62 = vmul.f32 %v313_v49, %v180_v58 }
  0xbc   :  { %v175_v1 = vsel %vm174_vm5, %v311_v48, %v171_v59 }
  0xbd   :  { %v185_v3 = vsel %vm184_vm7, %v313_v49, %v181_v62  ;;  %v186_v4 = vmul.f32 %v175_v1, %v162_v61 }
  0xbe   :  { %v187_v6 = vmul.f32 %v185_v3, %v163_v0 }
  0xbf   :  { %v194_v9 = vadd.f32 %v190_v63, %v186_v4 }
  0xc0   :  { %v195_v11 = vadd.f32 %v191_v2, %v187_v6 }
  0xc1   :  { %v228_v12 = vmul.f32 %v197_v5, %v194_v9 }
  0xc2   :  { %v200_v13 = vmax.f32 %v194_v9, %v195_v11  ;;  %v229_v14 = vmul.f32 %v198_v8, %v195_v11 }
  0xc4   :  { %201 = vmax.xlane.f32.xlu0 %v200_v13  ;;  %v230_v7 = vadd.f32 %v229_v14, %v228_v12 }
  0xc6   :  { %231 = vadd.xlane.f32.xlu2 %v230_v7 }
 0x137   :  { %v202_v17 = vpop.xlane.xlu0 %201 }
 0x138   :  { %v203_v19 = vmax.f32 %v199_v16, %v202_v17 }
 0x139   :  { %v232_v20 = vpop.xlane.xlu2 %231 }
 0x13a   :  { %v205_v21 = vsub.f32 %v199_v16, %v203_v19  ;;  %226 = vst.msk [vmem:[#allocation2] sm:$0xff] %vm80_vm1, %v203_v19  ;;  %v233_v22 = vadd.f32 %v232_v20, %v227_v18  ;;  %211 = vperm.xlu0 %309, %v203_v19  }
 0x13c   :  { %234 = vst.msk [vmem:[#allocation4] sm:$0xff] %vm80_vm1, %v233_v22  ;;  %v206_v32 = vmul.f32 1.442695, %v205_v21 }
 0x141   :  { %v244_v44 = vld [vmem:[#allocation2] sm:$0xff] }
 0x143   :  { %v251_v48 = vld [vmem:[#allocation4] sm:$0xff] }
 0x1ac   :  { %v212_v23 = vpop.permute.xlu0 %211 }
 0x1ad   :  { %v214_v24 = vsub.f32 %v194_v9, %v212_v23  ;;  %v215_v25 = vsub.f32 %v195_v11, %v212_v23 }
 0x1af   :  { %v216_v26 = vmul.f32 1.442695, %v214_v24  ;;  %v218_v27 = vmul.f32 1.442695, %v215_v25 }
 0x1b1   :  { %314 = vpow2.f32 %v216_v26 }
 0x1b2   :  { %316 = vpow2.f32 %v218_v27 }
 0x1b3   :  { %318 = vpow2.f32 %v206_v32 }
 0x1b7   :  { %v315_v28 = vpop.eup %314 }
 0x1b8   :  { %v317_v29 = vpop.eup %316 }
 0x1b9   :  { %v220_v30 = vadd.f32 %v317_v29, %v315_v28  ;;  %v319_v33 = vpop.eup %318 }
 0x1ba   :  { %v208_v35 = vmul.f32 %v319_v33, %v204_v34 }
 0x1bb   :  { %221 = vadd.xlane.f32.xlu1 %v220_v30 }
 0x1c3   :  { %237 = vadd.xlane.f32.xlu1 %v236_v31 }
 0x22e   :  { %v222_v36 = vpop.xlane.xlu1 %221 }
 0x22f   :  { %v223_v37 = vadd.f32 %v222_v36, %v208_v35 }
 0x231   :  { %225 = vst.msk [vmem:[#allocation3] sm:$0xff] %vm80_vm1, %v223_v37 }
 0x236   :  { %v238_v39 = vpop.xlane.xlu1 %237 }
 0x237   :  { %v239_v40 = vadd.f32 %v238_v39, %v235_v38 }
 0x238   :  { %v245_v41 = vld [vmem:[#allocation3] sm:$0xff] }
 0x239   :  { %240 = vst.msk [vmem:[#allocation5] sm:$0xff] %vm80_vm1, %v239_v40  ;;  %320 = vlog2.f32 %v245_v41 }
 0x23f   :  { %v321_v42 = vpop.eup %320 }
 0x240   :  { %v247_v43 = vmul.f32 0.6931472, %v321_v42  ;;  %v249_v45 = vld [vmem:[#allocation5] sm:$0xff] }
 0x242   :  { %v248_v46 = vadd.f32 %v247_v43, %v244_v44 }
 0x244   :  { %v250_v47 = vmul.f32 %v249_v45, %v248_v46 }
 0x246   :  { %v252_v49 = vsub.f32 %v250_v47, %v251_v48 }
 0x248   :  { %v253_v50 = vsel %vm80_vm1, %v252_v49, 0.0 }
 0x249   :  { %254 = vadd.xlane.f32.xlu2 %v253_v50 }
 0x2bc   :  { %v255_v51 = vpop.xlane.xlu2 %254 }
 0x2bd   :  { %v256_v52 = vrot.slane %v255_v51, 4 }
 0x2bf   :  { %v257_v53 = vadd.f32 %v256_v52, %v255_v51 }
 0x2c1   :  { %v258_v54 = vrot.slane %v257_v53, 2 }
 0x2c3   :  { %v259_v55 = vadd.f32 %v258_v54, %v257_v53 }
 0x2c5   :  { %v260_v56 = vrot.slane %v259_v55, 1 }
 0x2c7   :  { %v261_v57 = vadd.f32 %v260_v56, %v259_v55 }
 0x2c9   :  { %297 = vpush %v261_v57 }
 0x2fa   :  { %s298_s12 = spop %297 }
 0x2fb   :  { %s263_s13 = smul.f32 0.125, %s298_s12 }
 0x2fd   :  { %v264_v58 = vstv %s263_s13 }
 0x2fe   :  { %265 = vst [vmem:[#allocation14] sm:$0x1] %v264_v58 }
 0x2ff   :  { %276 = dma.vmem_to_hbm [thread:$0]  %s272_s3, 16, %s274_s11, [#allocation8]  }
 0x300   :  { %448 = dma.done.wait [#allocation8], 16  }
 0x301   :  { %449 = vsyncadd [#allocation8], 4294967280 }
 0x302   :  { %281 = vsyncpa [#allocation7], 1 }
 0x303   :  { %282 = vsyncpa [#allocation10], 1 }
 0x304   :  { %283 = vsyncpa [#allocation13], 1 }
 0x305   :  { %284 = vsyncpa [#allocation8], 1 }

</bundles_post_ra>
